<compile_context>
chip_gen: v5e
topology: v5e:2x2
jax: 0.10.0
libtpu: 0.0.40
codegen_flags: <defaults>
</compile_context>

<pallas_src>
import functools

import jax
import jax.numpy as jnp
from jax.experimental import pallas as pl
from jax.experimental.pallas import tpu as pltpu


def _model_kernel(
    xin_ref,               # ((T-1)*B, Din)  bf16, time-major flattened cat(x, c)
    w1_ref, b1_ref,        # encoder L1: (Din, Henc) bf16, (1, Henc) f32
    wg_ref, bg_ref,        # fused (w2 @ wih): (Henc, 4H) bf16, (1, 4H) f32  [g cols x2]
    whh_ref,               # LSTM recurrent: (H, 4H) bf16                   [g cols x2]
    wdec_ref, bdec_ref,    # fused decoder [mu | v]: (H, 2*Do) bf16, (1, 2*Do) f32
    out_ref,               # ((T-1)*B, 2*Do) f32, time-major, [mu | v]
    *, Tm1, B, H,
):
    # ---- encoder L1: one flat 2-D MXU pass + tanh --------------------------
    h1 = jnp.tanh(
        jnp.dot(xin_ref[...], w1_ref[...], preferred_element_type=jnp.float32)
        + b1_ref[...]
    )

    # ---- fused (encoder L2 o LSTM input projection), bias folded -----------
    # gin row (t*B + b) holds the input contribution to the gates at step t.
    gin = (
        jnp.dot(h1.astype(jnp.bfloat16), wg_ref[...],
                preferred_element_type=jnp.float32)
        + bg_ref[...]
    )                                                   # ((T-1)*B, 4H), in vregs

    whh = whh_ref[...]                                  # (H, 4H) bf16, g cols x2

    # ---- LSTM recurrence, fully unrolled, state carried in vregs -----------
    h = jnp.zeros((B, H), jnp.float32)
    c_state = jnp.zeros((B, H), jnp.float32)
    h_steps = []
    for t in range(Tm1):                                # static unroll (T-1 = 7)
        gates = gin[t * B:(t + 1) * B, :] + jnp.dot(
            h.astype(jnp.bfloat16), whh, preferred_element_type=jnp.float32)
        sg = jax.nn.sigmoid(gates)                      # one full-width EUP pass
        i_g = sg[:, 0 * H:1 * H]
        f_g = sg[:, 1 * H:2 * H]
        g_g = 2.0 * sg[:, 2 * H:3 * H] - 1.0            # == tanh(raw g-gate)
        o_g = sg[:, 3 * H:4 * H]
        c_state = f_g * c_state + i_g * g_g
        h = o_g * jnp.tanh(c_state)
        h_steps.append(h)

    # ---- fused decoder heads (mu | v): one (14,32)@(32,2*Do) MXU pass -------
    hxt = jnp.concatenate(h_steps, axis=0)              # ((T-1)*B, H), time-major
    out_ref[...] = (
        jnp.dot(hxt.astype(jnp.bfloat16), wdec_ref[...],
                preferred_element_type=jnp.float32)
        + bdec_ref[...]
    ).astype(out_ref.dtype)


def model_cvd_series_forward(x, c, params):
    """x: (B, T, Dx), c: (B, T, Dc).  Returns (logits, v), each (B, T-1, Do)."""
    B, T, Dx = x.shape
    Dc = c.shape[2]
    Tm1 = T - 1

    w1, b1, w2, b2, wih, whh, bl, wmu, bmu, wv, bv = params
    H = whh.shape[0]
    Do = wmu.shape[1]

    # ---- one-time XLA-side prep (all tiny) ----------------------------------
    # pre-concat + slice to T-1 + time-major flatten of the encoder input
    x_input = jnp.concatenate([x[:, :Tm1, :], c[:, :Tm1, :]], axis=2)   # (B,T-1,Din)
    xin = jnp.transpose(x_input, (1, 0, 2)).reshape(Tm1 * B, Dx + Dc)   # row = t*B+b

    # fuse encoder layer 2 into the LSTM input projection (exact)
    wg = w2 @ wih                                   # (Henc, 4H)
    bg = b2 @ wih + bl                              # (1, 4H)

    # tanh(x) = 2*sigmoid(2x) - 1: pre-scale the g-gate columns by 2
    gsl = slice(2 * H, 3 * H)
    wg = wg.at[:, gsl].multiply(2.0)
    bg = bg.at[:, gsl].multiply(2.0)
    whh_s = whh.at[:, gsl].multiply(2.0)

    # fuse the decoder heads column-wise: [mu | v]
    wdec = jnp.concatenate([wmu, wv], axis=1)       # (H, 2*Do)
    bdec = jnp.concatenate([bmu, bv], axis=1)       # (1, 2*Do)

    # bf16 matmul inputs (f32 accumulation in-kernel)
    xin_b = xin.astype(jnp.bfloat16)
    w1_b = w1.astype(jnp.bfloat16)
    wg_b = wg.astype(jnp.bfloat16)
    whh_b = whh_s.astype(jnp.bfloat16)
    wdec_b = wdec.astype(jnp.bfloat16)

    vmem = pl.BlockSpec(memory_space=pltpu.MemorySpace.VMEM)
    kernel = functools.partial(_model_kernel, Tm1=Tm1, B=B, H=H)

    out_flat = pl.pallas_call(
        kernel,
        out_shape=jax.ShapeDtypeStruct((Tm1 * B, 2 * Do), jnp.float32),
        in_specs=[vmem] * 8,
        out_specs=vmem,
    )(xin_b, w1_b, b1, wg_b, bg, whh_b, wdec_b, bdec)

    # tiny ((T-1)*B, 2*Do) -> (B, T-1, 2*Do) reshuffle + head split (wrapper side)
    out = out_flat.reshape(Tm1, B, 2 * Do).transpose(1, 0, 2)
    logits = out[..., :Do]
    v = out[..., Do:]
    return logits, v


def _reference_forward(x, c, params):
    """Pure-JAX reference matching the PyTorch forward (sanity check)."""
    w1, b1, w2, b2, wih, whh, bl, wmu, bmu, wv, bv = params
    H = whh.shape[0]
    x_input = jnp.concatenate([x[:, :-1, :], c[:, :-1, :]], axis=2)
    h1 = jnp.tanh(x_input @ w1 + b1)
    hx = h1 @ w2 + b2                               # (B, T-1, E)
    B, Tm1, _ = hx.shape

    def step(carry, x_t):
        h, cst = carry
        gates = x_t @ wih + h @ whh + bl
        i_g = jax.nn.sigmoid(gates[:, 0 * H:1 * H])
        f_g = jax.nn.sigmoid(gates[:, 1 * H:2 * H])
        g_g = jnp.tanh(gates[:, 2 * H:3 * H])
        o_g = jax.nn.sigmoid(gates[:, 3 * H:4 * H])
        c_new = f_g * cst + i_g * g_g
        h_new = o_g * jnp.tanh(c_new)
        return (h_new, c_new), h_new

    init = (jnp.zeros((B, H), jnp.float32), jnp.zeros((B, H), jnp.float32))
    _, hxt = jax.lax.scan(step, init, jnp.transpose(hx, (1, 0, 2)))
    hxt = jnp.transpose(hxt, (1, 0, 2))             # (B, T-1, H)
    return hxt @ wmu + bmu, hxt @ wv + bv


def init_params(key, din, henc, e, h, do):
    """Deterministic synthetic parameters (shapes follow the PyTorch module)."""
    ks = jax.random.split(key, 11)
    s = 0.1
    w1 = s * jax.random.normal(ks[0], (din, henc), jnp.float32)
    b1 = s * jax.random.normal(ks[1], (1, henc), jnp.float32)
    w2 = s * jax.random.normal(ks[2], (henc, e), jnp.float32)
    b2 = s * jax.random.normal(ks[3], (1, e), jnp.float32)
    # LSTM weights stored transposed relative to PyTorch (input-major for x @ W)
    wih = s * jax.random.normal(ks[4], (e, 4 * h), jnp.float32)
    whh = s * jax.random.normal(ks[5], (h, 4 * h), jnp.float32)
    bl = s * jax.random.normal(ks[6], (1, 4 * h), jnp.float32)   # b_ih + b_hh combined
    wmu = s * jax.random.normal(ks[7], (h, do), jnp.float32)
    bmu = s * jax.random.normal(ks[8], (1, do), jnp.float32)
    wv = s * jax.random.normal(ks[9], (h, do), jnp.float32)
    bv = s * jax.random.normal(ks[10], (1, do), jnp.float32)
    return (w1, b1, w2, b2, wih, whh, bl, wmu, bmu, wv, bv)


if __name__ == "__main__":
    # net_parameters: output_dim (= LSTM input size) = 16, hidden_dim = 32, batch_size = 2
    B, T = 2, 8          # sequence length 8 -> model consumes T-1 = 7 steps
    Dx, Dc = 3, 4        # state dim (3, per predict_profile) + concentration dim
    E = 16               # encoder output / LSTM input size
    Henc = 32            # encoder hidden width
    H = 32               # LSTM hidden_dim
    Do = 3               # decoder output dim (logits / v)

    key = jax.random.PRNGKey(0)
    kx, kc, kp = jax.random.split(key, 3)
    x = jax.random.normal(kx, (B, T, Dx), jnp.float32)
    c = jax.random.normal(kc, (B, T, Dc), jnp.float32)
    params = init_params(kp, Dx + Dc, Henc, E, H, Do)

    logits, v = model_cvd_series_forward(x, c, params)
    jax.block_until_ready((logits, v))
    assert logits.shape == (B, T - 1, Do) and v.shape == (B, T - 1, Do)

    # loose-tolerance sanity check against the pure-JAX f32 reference (kernel
    # uses bf16 matmul inputs with f32 accumulation; only catch gross errors)
    ref_logits, ref_v = _reference_forward(x, c, params)
    assert jnp.allclose(logits, ref_logits, atol=5e-2, rtol=5e-2)
    assert jnp.allclose(v, ref_v, atol=5e-2, rtol=5e-2)

    print("KERNEL_OK")
</pallas_src>

<mosaic_0001>
module attributes {stable_mosaic.version = 11 : i64} {
  func.func @_model_kernel(%arg0: memref<14x7xbf16, #tpu.memory_space<vmem>>, %arg1: memref<7x32xbf16, #tpu.memory_space<vmem>>, %arg2: memref<1x32xf32, #tpu.memory_space<vmem>>, %arg3: memref<32x128xbf16, #tpu.memory_space<vmem>>, %arg4: memref<1x128xf32, #tpu.memory_space<vmem>>, %arg5: memref<32x128xbf16, #tpu.memory_space<vmem>>, %arg6: memref<32x6xbf16, #tpu.memory_space<vmem>>, %arg7: memref<1x6xf32, #tpu.memory_space<vmem>>, %arg8: memref<14x6xf32, #tpu.memory_space<vmem>>) attributes {dimension_semantics = [], scalar_prefetch = 0 : i64, scratch_operands = 0 : i64, tpu.core_type = #tpu.core_type<tc>} {
    %c0 = arith.constant 0 : index
    %c0_0 = arith.constant 0 : index
    %0 = vector.load %arg0[%c0, %c0_0] : memref<14x7xbf16, #tpu.memory_space<vmem>>, vector<14x7xbf16>
    %c0_1 = arith.constant 0 : index
    %c0_2 = arith.constant 0 : index
    %1 = vector.load %arg1[%c0_1, %c0_2] : memref<7x32xbf16, #tpu.memory_space<vmem>>, vector<7x32xbf16>
    %cst = arith.constant dense<0.000000e+00> : vector<14x32xf32>
    %2 = tpu.matmul %0, %1, %cst {dimension_numbers = #tpu.dot_dimension_numbers<[1], [0], [0], [1], [0, 0, 1, 1], [], []>} : vector<14x7xbf16>, vector<7x32xbf16>, vector<14x32xf32> -> vector<14x32xf32>
    %c0_3 = arith.constant 0 : index
    %c0_4 = arith.constant 0 : index
    %3 = vector.load %arg2[%c0_3, %c0_4] : memref<1x32xf32, #tpu.memory_space<vmem>>, vector<1x32xf32>
    %4 = vector.broadcast %3 : vector<1x32xf32> to vector<14x32xf32>
    %5 = arith.addf %2, %4 : vector<14x32xf32>
    %6 = math.tanh %5 : vector<14x32xf32>
    %7 = arith.truncf %6 : vector<14x32xf32> to vector<14x32xbf16>
    %c0_5 = arith.constant 0 : index
    %c0_6 = arith.constant 0 : index
    %8 = vector.load %arg3[%c0_5, %c0_6] : memref<32x128xbf16, #tpu.memory_space<vmem>>, vector<32x128xbf16>
    %cst_7 = arith.constant dense<0.000000e+00> : vector<14x128xf32>
    %9 = tpu.matmul %7, %8, %cst_7 {dimension_numbers = #tpu.dot_dimension_numbers<[1], [0], [0], [1], [0, 0, 1, 1], [], []>} : vector<14x32xbf16>, vector<32x128xbf16>, vector<14x128xf32> -> vector<14x128xf32>
    %c0_8 = arith.constant 0 : index
    %c0_9 = arith.constant 0 : index
    %10 = vector.load %arg4[%c0_8, %c0_9] : memref<1x128xf32, #tpu.memory_space<vmem>>, vector<1x128xf32>
    %11 = vector.broadcast %10 : vector<1x128xf32> to vector<14x128xf32>
    %12 = arith.addf %9, %11 : vector<14x128xf32>
    %c0_10 = arith.constant 0 : index
    %c0_11 = arith.constant 0 : index
    %13 = vector.load %arg5[%c0_10, %c0_11] : memref<32x128xbf16, #tpu.memory_space<vmem>>, vector<32x128xbf16>
    %cst_12 = arith.constant 0.000000e+00 : f32
    %14 = vector.broadcast %cst_12 : f32 to vector<2x32xf32>
    %cst_13 = arith.constant 0.000000e+00 : f32
    %15 = vector.broadcast %cst_13 : f32 to vector<2x32xf32>
    %16 = vector.extract_strided_slice %12 {offsets = [0, 0], sizes = [2, 128], strides = [1, 1]} : vector<14x128xf32> to vector<2x128xf32>
    %17 = arith.truncf %14 : vector<2x32xf32> to vector<2x32xbf16>
    %cst_14 = arith.constant dense<0.000000e+00> : vector<2x128xf32>
    %18 = tpu.matmul %17, %13, %cst_14 {dimension_numbers = #tpu.dot_dimension_numbers<[1], [0], [0], [1], [0, 0, 1, 1], [], []>} : vector<2x32xbf16>, vector<32x128xbf16>, vector<2x128xf32> -> vector<2x128xf32>
    %19 = arith.addf %16, %18 : vector<2x128xf32>
    %20 = arith.negf %19 : vector<2x128xf32>
    %21 = math.exp %20 : vector<2x128xf32>
    %cst_15 = arith.constant 1.000000e+00 : f32
    %22 = vector.broadcast %cst_15 : f32 to vector<2x128xf32>
    %23 = arith.addf %22, %21 : vector<2x128xf32>
    %24 = arith.divf %22, %23 : vector<2x128xf32>
    %25 = vector.extract_strided_slice %24 {offsets = [0, 0], sizes = [2, 32], strides = [1, 1]} : vector<2x128xf32> to vector<2x32xf32>
    %26 = vector.extract_strided_slice %24 {offsets = [0, 32], sizes = [2, 32], strides = [1, 1]} : vector<2x128xf32> to vector<2x32xf32>
    %27 = vector.extract_strided_slice %24 {offsets = [0, 64], sizes = [2, 32], strides = [1, 1]} : vector<2x128xf32> to vector<2x32xf32>
    %cst_16 = arith.constant 2.000000e+00 : f32
    %28 = vector.broadcast %cst_16 : f32 to vector<2x32xf32>
    %29 = arith.mulf %28, %27 : vector<2x32xf32>
    %cst_17 = arith.constant 1.000000e+00 : f32
    %30 = vector.broadcast %cst_17 : f32 to vector<2x32xf32>
    %31 = arith.subf %29, %30 : vector<2x32xf32>
    %32 = vector.extract_strided_slice %24 {offsets = [0, 96], sizes = [2, 32], strides = [1, 1]} : vector<2x128xf32> to vector<2x32xf32>
    %33 = arith.mulf %26, %15 : vector<2x32xf32>
    %34 = arith.mulf %25, %31 : vector<2x32xf32>
    %35 = arith.addf %33, %34 : vector<2x32xf32>
    %36 = math.tanh %35 : vector<2x32xf32>
    %37 = arith.mulf %32, %36 : vector<2x32xf32>
    %38 = vector.extract_strided_slice %12 {offsets = [2, 0], sizes = [2, 128], strides = [1, 1]} : vector<14x128xf32> to vector<2x128xf32>
    %39 = arith.truncf %37 : vector<2x32xf32> to vector<2x32xbf16>
    %cst_18 = arith.constant dense<0.000000e+00> : vector<2x128xf32>
    %40 = tpu.matmul %39, %13, %cst_18 {dimension_numbers = #tpu.dot_dimension_numbers<[1], [0], [0], [1], [0, 0, 1, 1], [], []>} : vector<2x32xbf16>, vector<32x128xbf16>, vector<2x128xf32> -> vector<2x128xf32>
    %41 = arith.addf %38, %40 : vector<2x128xf32>
    %42 = arith.negf %41 : vector<2x128xf32>
    %43 = math.exp %42 : vector<2x128xf32>
    %cst_19 = arith.constant 1.000000e+00 : f32
    %44 = vector.broadcast %cst_19 : f32 to vector<2x128xf32>
    %45 = arith.addf %44, %43 : vector<2x128xf32>
    %46 = arith.divf %44, %45 : vector<2x128xf32>
    %47 = vector.extract_strided_slice %46 {offsets = [0, 0], sizes = [2, 32], strides = [1, 1]} : vector<2x128xf32> to vector<2x32xf32>
    %48 = vector.extract_strided_slice %46 {offsets = [0, 32], sizes = [2, 32], strides = [1, 1]} : vector<2x128xf32> to vector<2x32xf32>
    %49 = vector.extract_strided_slice %46 {offsets = [0, 64], sizes = [2, 32], strides = [1, 1]} : vector<2x128xf32> to vector<2x32xf32>
    %cst_20 = arith.constant 2.000000e+00 : f32
    %50 = vector.broadcast %cst_20 : f32 to vector<2x32xf32>
    %51 = arith.mulf %50, %49 : vector<2x32xf32>
    %cst_21 = arith.constant 1.000000e+00 : f32
    %52 = vector.broadcast %cst_21 : f32 to vector<2x32xf32>
    %53 = arith.subf %51, %52 : vector<2x32xf32>
    %54 = vector.extract_strided_slice %46 {offsets = [0, 96], sizes = [2, 32], strides = [1, 1]} : vector<2x128xf32> to vector<2x32xf32>
    %55 = arith.mulf %48, %35 : vector<2x32xf32>
    %56 = arith.mulf %47, %53 : vector<2x32xf32>
    %57 = arith.addf %55, %56 : vector<2x32xf32>
    %58 = math.tanh %57 : vector<2x32xf32>
    %59 = arith.mulf %54, %58 : vector<2x32xf32>
    %60 = vector.extract_strided_slice %12 {offsets = [4, 0], sizes = [2, 128], strides = [1, 1]} : vector<14x128xf32> to vector<2x128xf32>
    %61 = arith.truncf %59 : vector<2x32xf32> to vector<2x32xbf16>
    %cst_22 = arith.constant dense<0.000000e+00> : vector<2x128xf32>
    %62 = tpu.matmul %61, %13, %cst_22 {dimension_numbers = #tpu.dot_dimension_numbers<[1], [0], [0], [1], [0, 0, 1, 1], [], []>} : vector<2x32xbf16>, vector<32x128xbf16>, vector<2x128xf32> -> vector<2x128xf32>
    %63 = arith.addf %60, %62 : vector<2x128xf32>
    %64 = arith.negf %63 : vector<2x128xf32>
    %65 = math.exp %64 : vector<2x128xf32>
    %cst_23 = arith.constant 1.000000e+00 : f32
    %66 = vector.broadcast %cst_23 : f32 to vector<2x128xf32>
    %67 = arith.addf %66, %65 : vector<2x128xf32>
    %68 = arith.divf %66, %67 : vector<2x128xf32>
    %69 = vector.extract_strided_slice %68 {offsets = [0, 0], sizes = [2, 32], strides = [1, 1]} : vector<2x128xf32> to vector<2x32xf32>
    %70 = vector.extract_strided_slice %68 {offsets = [0, 32], sizes = [2, 32], strides = [1, 1]} : vector<2x128xf32> to vector<2x32xf32>
    %71 = vector.extract_strided_slice %68 {offsets = [0, 64], sizes = [2, 32], strides = [1, 1]} : vector<2x128xf32> to vector<2x32xf32>
    %cst_24 = arith.constant 2.000000e+00 : f32
    %72 = vector.broadcast %cst_24 : f32 to vector<2x32xf32>
    %73 = arith.mulf %72, %71 : vector<2x32xf32>
    %cst_25 = arith.constant 1.000000e+00 : f32
    %74 = vector.broadcast %cst_25 : f32 to vector<2x32xf32>
    %75 = arith.subf %73, %74 : vector<2x32xf32>
    %76 = vector.extract_strided_slice %68 {offsets = [0, 96], sizes = [2, 32], strides = [1, 1]} : vector<2x128xf32> to vector<2x32xf32>
    %77 = arith.mulf %70, %57 : vector<2x32xf32>
    %78 = arith.mulf %69, %75 : vector<2x32xf32>
    %79 = arith.addf %77, %78 : vector<2x32xf32>
    %80 = math.tanh %79 : vector<2x32xf32>
    %81 = arith.mulf %76, %80 : vector<2x32xf32>
    %82 = vector.extract_strided_slice %12 {offsets = [6, 0], sizes = [2, 128], strides = [1, 1]} : vector<14x128xf32> to vector<2x128xf32>
    %83 = arith.truncf %81 : vector<2x32xf32> to vector<2x32xbf16>
    %cst_26 = arith.constant dense<0.000000e+00> : vector<2x128xf32>
    %84 = tpu.matmul %83, %13, %cst_26 {dimension_numbers = #tpu.dot_dimension_numbers<[1], [0], [0], [1], [0, 0, 1, 1], [], []>} : vector<2x32xbf16>, vector<32x128xbf16>, vector<2x128xf32> -> vector<2x128xf32>
    %85 = arith.addf %82, %84 : vector<2x128xf32>
    %86 = arith.negf %85 : vector<2x128xf32>
    %87 = math.exp %86 : vector<2x128xf32>
    %cst_27 = arith.constant 1.000000e+00 : f32
    %88 = vector.broadcast %cst_27 : f32 to vector<2x128xf32>
    %89 = arith.addf %88, %87 : vector<2x128xf32>
    %90 = arith.divf %88, %89 : vector<2x128xf32>
    %91 = vector.extract_strided_slice %90 {offsets = [0, 0], sizes = [2, 32], strides = [1, 1]} : vector<2x128xf32> to vector<2x32xf32>
    %92 = vector.extract_strided_slice %90 {offsets = [0, 32], sizes = [2, 32], strides = [1, 1]} : vector<2x128xf32> to vector<2x32xf32>
    %93 = vector.extract_strided_slice %90 {offsets = [0, 64], sizes = [2, 32], strides = [1, 1]} : vector<2x128xf32> to vector<2x32xf32>
    %cst_28 = arith.constant 2.000000e+00 : f32
    %94 = vector.broadcast %cst_28 : f32 to vector<2x32xf32>
    %95 = arith.mulf %94, %93 : vector<2x32xf32>
    %cst_29 = arith.constant 1.000000e+00 : f32
    %96 = vector.broadcast %cst_29 : f32 to vector<2x32xf32>
    %97 = arith.subf %95, %96 : vector<2x32xf32>
    %98 = vector.extract_strided_slice %90 {offsets = [0, 96], sizes = [2, 32], strides = [1, 1]} : vector<2x128xf32> to vector<2x32xf32>
    %99 = arith.mulf %92, %79 : vector<2x32xf32>
    %100 = arith.mulf %91, %97 : vector<2x32xf32>
    %101 = arith.addf %99, %100 : vector<2x32xf32>
    %102 = math.tanh %101 : vector<2x32xf32>
    %103 = arith.mulf %98, %102 : vector<2x32xf32>
    %104 = vector.extract_strided_slice %12 {offsets = [8, 0], sizes = [2, 128], strides = [1, 1]} : vector<14x128xf32> to vector<2x128xf32>
    %105 = arith.truncf %103 : vector<2x32xf32> to vector<2x32xbf16>
    %cst_30 = arith.constant dense<0.000000e+00> : vector<2x128xf32>
    %106 = tpu.matmul %105, %13, %cst_30 {dimension_numbers = #tpu.dot_dimension_numbers<[1], [0], [0], [1], [0, 0, 1, 1], [], []>} : vector<2x32xbf16>, vector<32x128xbf16>, vector<2x128xf32> -> vector<2x128xf32>
    %107 = arith.addf %104, %106 : vector<2x128xf32>
    %108 = arith.negf %107 : vector<2x128xf32>
    %109 = math.exp %108 : vector<2x128xf32>
    %cst_31 = arith.constant 1.000000e+00 : f32
    %110 = vector.broadcast %cst_31 : f32 to vector<2x128xf32>
    %111 = arith.addf %110, %109 : vector<2x128xf32>
    %112 = arith.divf %110, %111 : vector<2x128xf32>
    %113 = vector.extract_strided_slice %112 {offsets = [0, 0], sizes = [2, 32], strides = [1, 1]} : vector<2x128xf32> to vector<2x32xf32>
    %114 = vector.extract_strided_slice %112 {offsets = [0, 32], sizes = [2, 32], strides = [1, 1]} : vector<2x128xf32> to vector<2x32xf32>
    %115 = vector.extract_strided_slice %112 {offsets = [0, 64], sizes = [2, 32], strides = [1, 1]} : vector<2x128xf32> to vector<2x32xf32>
    %cst_32 = arith.constant 2.000000e+00 : f32
    %116 = vector.broadcast %cst_32 : f32 to vector<2x32xf32>
    %117 = arith.mulf %116, %115 : vector<2x32xf32>
    %cst_33 = arith.constant 1.000000e+00 : f32
    %118 = vector.broadcast %cst_33 : f32 to vector<2x32xf32>
    %119 = arith.subf %117, %118 : vector<2x32xf32>
    %120 = vector.extract_strided_slice %112 {offsets = [0, 96], sizes = [2, 32], strides = [1, 1]} : vector<2x128xf32> to vector<2x32xf32>
    %121 = arith.mulf %114, %101 : vector<2x32xf32>
    %122 = arith.mulf %113, %119 : vector<2x32xf32>
    %123 = arith.addf %121, %122 : vector<2x32xf32>
    %124 = math.tanh %123 : vector<2x32xf32>
    %125 = arith.mulf %120, %124 : vector<2x32xf32>
    %126 = vector.extract_strided_slice %12 {offsets = [10, 0], sizes = [2, 128], strides = [1, 1]} : vector<14x128xf32> to vector<2x128xf32>
    %127 = arith.truncf %125 : vector<2x32xf32> to vector<2x32xbf16>
    %cst_34 = arith.constant dense<0.000000e+00> : vector<2x128xf32>
    %128 = tpu.matmul %127, %13, %cst_34 {dimension_numbers = #tpu.dot_dimension_numbers<[1], [0], [0], [1], [0, 0, 1, 1], [], []>} : vector<2x32xbf16>, vector<32x128xbf16>, vector<2x128xf32> -> vector<2x128xf32>
    %129 = arith.addf %126, %128 : vector<2x128xf32>
    %130 = arith.negf %129 : vector<2x128xf32>
    %131 = math.exp %130 : vector<2x128xf32>
    %cst_35 = arith.constant 1.000000e+00 : f32
    %132 = vector.broadcast %cst_35 : f32 to vector<2x128xf32>
    %133 = arith.addf %132, %131 : vector<2x128xf32>
    %134 = arith.divf %132, %133 : vector<2x128xf32>
    %135 = vector.extract_strided_slice %134 {offsets = [0, 0], sizes = [2, 32], strides = [1, 1]} : vector<2x128xf32> to vector<2x32xf32>
    %136 = vector.extract_strided_slice %134 {offsets = [0, 32], sizes = [2, 32], strides = [1, 1]} : vector<2x128xf32> to vector<2x32xf32>
    %137 = vector.extract_strided_slice %134 {offsets = [0, 64], sizes = [2, 32], strides = [1, 1]} : vector<2x128xf32> to vector<2x32xf32>
    %cst_36 = arith.constant 2.000000e+00 : f32
    %138 = vector.broadcast %cst_36 : f32 to vector<2x32xf32>
    %139 = arith.mulf %138, %137 : vector<2x32xf32>
    %cst_37 = arith.constant 1.000000e+00 : f32
    %140 = vector.broadcast %cst_37 : f32 to vector<2x32xf32>
    %141 = arith.subf %139, %140 : vector<2x32xf32>
    %142 = vector.extract_strided_slice %134 {offsets = [0, 96], sizes = [2, 32], strides = [1, 1]} : vector<2x128xf32> to vector<2x32xf32>
    %143 = arith.mulf %136, %123 : vector<2x32xf32>
    %144 = arith.mulf %135, %141 : vector<2x32xf32>
    %145 = arith.addf %143, %144 : vector<2x32xf32>
    %146 = math.tanh %145 : vector<2x32xf32>
    %147 = arith.mulf %142, %146 : vector<2x32xf32>
    %148 = vector.extract_strided_slice %12 {offsets = [12, 0], sizes = [2, 128], strides = [1, 1]} : vector<14x128xf32> to vector<2x128xf32>
    %149 = arith.truncf %147 : vector<2x32xf32> to vector<2x32xbf16>
    %cst_38 = arith.constant dense<0.000000e+00> : vector<2x128xf32>
    %150 = tpu.matmul %149, %13, %cst_38 {dimension_numbers = #tpu.dot_dimension_numbers<[1], [0], [0], [1], [0, 0, 1, 1], [], []>} : vector<2x32xbf16>, vector<32x128xbf16>, vector<2x128xf32> -> vector<2x128xf32>
    %151 = arith.addf %148, %150 : vector<2x128xf32>
    %152 = arith.negf %151 : vector<2x128xf32>
    %153 = math.exp %152 : vector<2x128xf32>
    %cst_39 = arith.constant 1.000000e+00 : f32
    %154 = vector.broadcast %cst_39 : f32 to vector<2x128xf32>
    %155 = arith.addf %154, %153 : vector<2x128xf32>
    %156 = arith.divf %154, %155 : vector<2x128xf32>
    %157 = vector.extract_strided_slice %156 {offsets = [0, 0], sizes = [2, 32], strides = [1, 1]} : vector<2x128xf32> to vector<2x32xf32>
    %158 = vector.extract_strided_slice %156 {offsets = [0, 32], sizes = [2, 32], strides = [1, 1]} : vector<2x128xf32> to vector<2x32xf32>
    %159 = vector.extract_strided_slice %156 {offsets = [0, 64], sizes = [2, 32], strides = [1, 1]} : vector<2x128xf32> to vector<2x32xf32>
    %cst_40 = arith.constant 2.000000e+00 : f32
    %160 = vector.broadcast %cst_40 : f32 to vector<2x32xf32>
    %161 = arith.mulf %160, %159 : vector<2x32xf32>
    %cst_41 = arith.constant 1.000000e+00 : f32
    %162 = vector.broadcast %cst_41 : f32 to vector<2x32xf32>
    %163 = arith.subf %161, %162 : vector<2x32xf32>
    %164 = vector.extract_strided_slice %156 {offsets = [0, 96], sizes = [2, 32], strides = [1, 1]} : vector<2x128xf32> to vector<2x32xf32>
    %165 = arith.mulf %158, %145 : vector<2x32xf32>
    %166 = arith.mulf %157, %163 : vector<2x32xf32>
    %167 = arith.addf %165, %166 : vector<2x32xf32>
    %168 = math.tanh %167 : vector<2x32xf32>
    %169 = arith.mulf %164, %168 : vector<2x32xf32>
    %170 = tpu.concatenate %37, %59, %81, %103, %125, %147, %169 in 0 : vector<2x32xf32>, vector<2x32xf32>, vector<2x32xf32>, vector<2x32xf32>, vector<2x32xf32>, vector<2x32xf32>, vector<2x32xf32> -> vector<14x32xf32>
    %171 = arith.truncf %170 : vector<14x32xf32> to vector<14x32xbf16>
    %c0_42 = arith.constant 0 : index
    %c0_43 = arith.constant 0 : index
    %172 = vector.load %arg6[%c0_42, %c0_43] : memref<32x6xbf16, #tpu.memory_space<vmem>>, vector<32x6xbf16>
    %cst_44 = arith.constant dense<0.000000e+00> : vector<14x6xf32>
    %173 = tpu.matmul %171, %172, %cst_44 {dimension_numbers = #tpu.dot_dimension_numbers<[1], [0], [0], [1], [0, 0, 1, 1], [], []>} : vector<14x32xbf16>, vector<32x6xbf16>, vector<14x6xf32> -> vector<14x6xf32>
    %c0_45 = arith.constant 0 : index
    %c0_46 = arith.constant 0 : index
    %174 = vector.load %arg7[%c0_45, %c0_46] : memref<1x6xf32, #tpu.memory_space<vmem>>, vector<1x6xf32>
    %175 = vector.broadcast %174 : vector<1x6xf32> to vector<14x6xf32>
    %176 = arith.addf %173, %175 : vector<14x6xf32>
    %c0_47 = arith.constant 0 : index
    %c0_48 = arith.constant 0 : index
    %177 = vector.load %arg8[%c0_47, %c0_48] : memref<14x6xf32, #tpu.memory_space<vmem>>, vector<14x6xf32>
    tpu.vector_store %arg8[%c0_47, %c0_48], %176 {strides = array<i32>} : memref<14x6xf32, #tpu.memory_space<vmem>>, vector<14x6xf32>,
    return
  }
}

</mosaic_0001>

<bundles_post_ra>
// kernel: tpu_custom_call.1
= control target key start
LH: loop header
LB: loop body
LE: loop exit
PB: predicated region body
PF: predicated region fallthrough
CT: control target
= control target key end

     0   :  { %13 = vsyncpa [#allocation3], 0  ;;  %s782_s30 = smov [#allocation2]   ;;  %s783_s10 = smov 64   ;;  %s943_s0 = inlined_call_operand.vmem [shape: bf16[14,7], index: 0, kind: input, shape index: {}]   ;;  %s944_s1 = inlined_call_operand.vmem [shape: bf16[7,32], index: 1, kind: input, shape index: {}]   ;;  %s945_s2 = inlined_call_operand.vmem [shape: f32[1,32], index: 2, kind: input, shape index: {}]   ;;  %s946_s3 = inlined_call_operand.vmem [shape: bf16[32,128], index: 3, kind: input, shape index: {}]   ;;  %s947_s4 = inlined_call_operand.vmem [shape: f32[1,128], index: 4, kind: input, shape index: {}]   ;;  %s948_s5 = inlined_call_operand.hbm [shape: bf16[32,128], index: 5, kind: input, shape index: {}]   ;;  %s949_s6 = inlined_call_operand.vmem [shape: bf16[32,6], index: 6, kind: input, shape index: {}]   ;;  %s950_s7 = inlined_call_operand.vmem [shape: f32[1,6], index: 7, kind: input, shape index: {}]   ;;  %s951_s8 = inlined_call_operand.vmem [shape: f32[14,6], index: 8, kind: output, shape index: {}]  }
   0x1   :  { %s28_s29 = sshll.u32 %s948_s5, 4  ;;  %s30_s9 = sshll.u32 %s782_s30, 4  ;;  %s29_s29 = int_to_ptr.hbm [resolvable:$true] %s28_s29  ;;  %s31_s9 = int_to_ptr.vmem [resolvable:$true] %s30_s9 }
   0x2   :  { %s784_s11 = smov 4  }
   0x3   :  { %36 = dma.hbm_to_vmem [thread:$0]  %s29_s29, 256, %s31_s9, [#allocation3], %s783_s10, %s783_s10, %s784_s11  }
   0x4   :  { %780 = dma.done.wait [#allocation3], 256  }
   0x5   :  { %781 = vsyncadd [#allocation3], 4294967040  ;;  %vm62_vm0 = vcmask 1042432   ;;  %vm63_vm1 = vcmask 1043456   ;;  %v785_v0 = vmov 65535   ;;  %vm58_vm2 = vcmask 56320  }
   0x6   :  { %v64_v1 = vsel %vm62_vm0, 4294967295, %v785_v0  ;;  %v48_v3 = vld [vmem:[%s944_s1] sm:$0xf]  ;;  %v694_v5 = vld [vmem:[%s943_s0] sm:$0x70]  ;;  %v698_v8 = vld [vmem:[#allocation2 + $0x8] sm:$0xff] }
   0x7   :  { %v65_v2 = vsel %vm63_vm1, %v64_v1, 0  ;;  %v645_v4 = vld [vmem:[%s943_s0] sm:$0xf]  ;;  %149 = vmatpush.bf16.msra.mxu2 %v698_v8  ;;  %208 = vmatpush.bf16.msra.mxu3 %v698_v8  ;;  %v786_v10 = vmov 0   ;;  %v696_v11 = vld [vmem:[%s946_s3 + $0x8] sm:$0xff]  ;;  %vm106_vm3 = vcmask 261120  }
   0x8   :  { %v67_v6 = vand.u32 %v65_v2, %v48_v3  ;;  %v646_v7 = vor.u32 %v694_v5, %v645_v4  ;;  %v697_v9 = vld [vmem:[#allocation2] sm:$0xff]  ;;  %116 = vmatpush.bf16.msra.mxu1 %v696_v11  ;;  %vm586_vm0 = vcmask 1041408  }
   0x9   :  { %v695_v12 = vld [vmem:[%s946_s3] sm:$0xff] }
   0xa   :  { %76 = vmatpush.bf16.msra.mxu0 %v67_v6  ;;  %v707_v14 = vld [vmem:[%s945_s2] ss:$0 sm:$0xff]  ;;  %s787_s2 = smov 32  }
   0xb   :  { %150 = vmatpush.bf16.msra.mxu2 %v697_v9  ;;  %209 = vmatpush.bf16.msra.mxu3 %v697_v9  ;;  %v861_v23 = vld [vmem:[%s947_s4] ss:$0 sm:$0xff] }
   0xc   :  { %117 = vmatpush.bf16.msra.mxu1 %v695_v12 }
   0xd   :  { %647 = vmatmul.msk.bf16.vlgmr.msra.gmra.mxu0 %vm58_vm2, %v646_v7 }
   0xe   :  { %274 = vmatpush.bf16.msrb.mxu0 %v698_v8  ;;  %151 = vmatmul.bf16.vlgmr.msra.gmra.mxu2 %v786_v10 }
   0xf   :  { %406 = vmatpush.bf16.msrb.mxu2 %v698_v8  ;;  %468 = vmatpush.bf16.msrb.mxu3 %v698_v8 }
  0x10   :  { %340 = vmatpush.bf16.msrb.mxu1 %v698_v8 }
  0x12   :  { %275 = vmatpush.bf16.msrb.mxu0 %v697_v9 }
  0x13   :  { %407 = vmatpush.bf16.msrb.mxu2 %v697_v9  ;;  %469 = vmatpush.bf16.msrb.mxu3 %v697_v9 }
  0x14   :  { %341 = vmatpush.bf16.msrb.mxu1 %v697_v9 }
  0x16   :  { %534 = vmatpush.bf16.msra.mxu0 %v698_v8 }
  0x1a   :  { %535 = vmatpush.bf16.msra.mxu0 %v697_v9 }
  0x8a   :  { %v78_v13 = vpop.f32.mrf.mxu0 }
  0x8b   :  { %v79_v15 = vadd.f32 %v707_v14, %v78_v13 }
  0x8d   :  { %710 = vtanh.f32 %v79_v15 }
  0x91   :  { %v152_v21 = vpop.f32.mrf.mxu2 }
  0x92   :  { %v80_v16 = vpop.f32.mrf.mxu0 }
  0x93   :  { %v81_v17 = vadd.f32 %v707_v14, %v80_v16  ;;  %v711_v18 = vpop.eup %710 }
  0x95   :  { %712 = vtanh.f32 %v81_v17 }
  0x99   :  { %v154_v22 = vpop.f32.mrf.mxu2 }
  0x9b   :  { %v713_v19 = vpop.eup %712 }
  0x9c   :  { %v85_v20 = vpack.c.bf16 %v713_v19, %v711_v18 }
  0x9e   :  { %656 = vmatmul.msk.bf16.vlgmr.msra.gmra.mxu1 %vm106_vm3, %v85_v20 }
 0x11b   :  { %v119_v24 = vpop.f32.mrf.mxu1 }
 0x11c   :  { %v864_v25 = vadd.f32 %v861_v23, %v119_v24 }
 0x11e   :  { %v156_v26 = vadd.f32 %v152_v21, %v864_v25 }
 0x120   :  { %v665_v27 = vmul.f32 -1.442695, %v156_v26 }
 0x122   :  { %714 = vpow2.f32 %v665_v27 }
 0x128   :  { %v715_v28 = vpop.eup %714 }
 0x129   :  { %v160_v29 = vadd.f32 1.0, %v715_v28 }
 0x12b   :  { %716 = vrcp.f32 %v160_v29  ;;  %v172_v33 = vand.u32 2147483648, %v160_v29  ;;  %v170_v35 = vand.u32 2147483647, %v160_v29  ;;  %vm166_vm5 = vweird.f32 %v160_v29 }
 0x12d   :  { %v173_v37 = vor.u32 1.1754944e-38, %v172_v33  ;;  %vm171_vm7 = vcmp.eq.f32.partialorder %v170_v35, 8.507059e+37 }
 0x131   :  { %v717_v30 = vpop.eup %716 }
 0x132   :  { %v162_v31 = vmul.f32 %v717_v30, %v160_v29  ;;  %vm167_vm4 = vweird.f32 %v717_v30 }
 0x133   :  { %vm168_vm6 = vmor %vm166_vm5, %vm167_vm4 }
 0x134   :  { %v163_v32 = vsub.f32 1.0, %v162_v31 }
 0x136   :  { %v164_v34 = vmul.f32 %v717_v30, %v163_v32 }
 0x138   :  { %v165_v36 = vadd.f32 %v717_v30, %v164_v34 }
 0x13a   :  { %v169_v38 = vsel %vm168_vm6, %v717_v30, %v165_v36 }
 0x13b   :  { %v174_v39 = vsel %vm171_vm7, %v173_v37, %v169_v38  ;;  %vm589_vm7 = vcmask 1045504  }
 0x13c   :  { %v176_v40 = vmul.f32 2.0, %v174_v39  ;;  %v178_v44 = vmul.f32 0.0, %v174_v39 }
 0x13e   :  { %v666_v41 = vadd.f32 -1.0, %v176_v40 }
 0x140   :  { %180 = vrot.lane.b32.xlu0 %v666_v41, %s783_s10 }
 0x1b2   :  { %v181_v42 = vpop.permute.xlu0 %180 }
 0x1b3   :  { %v183_v43 = vmul.f32 %v181_v42, %v174_v39 }
 0x1b5   :  { %185 = vrot.lane.b32.xlu0 %v183_v43, %s787_s2 }
 0x227   :  { %v186_v45 = vpop.permute.xlu0 %185 }
 0x228   :  { %v188_v46 = vadd.f32 %v186_v45, %v178_v44 }
 0x22a   :  { %718 = vtanh.f32 %v188_v46  ;;  %v241_v9 = vrot.slane %v188_v46, 6 }
 0x230   :  { %v719_v47 = vpop.eup %718 }
 0x231   :  { %191 = vrot.lane.b32.xlu1 %v719_v47, %s783_s10 }
 0x2a3   :  { %v192_v48 = vpop.permute.xlu1 %191 }
 0x2a4   :  { %v870_v49 = vmul.f32 %v192_v48, %v174_v39 }
 0x2a6   :  { %v195_v50 = vpack.c.bf16 %v870_v49, %v870_v49 }
 0x2a8   :  { %197 = vrot.lane.b32.xlu1 %v195_v50, %s787_s2 }
 0x31a   :  { %v198_v51 = vpop.permute.xlu1 %197 }
 0x31b   :  { %667 = vmatmul.msk.bf16.vlgmr.msra.gmra.mxu3 %vm106_vm3, %v198_v51 }
 0x39e   :  { %v211_v52 = vpop.f32.mrf.mxu3 }
 0x39f   :  { %v216_v53 = vrot.slane %v211_v52, 6 }
 0x3a1   :  { %v218_v54 = vadd.f32 %v216_v53, %v864_v25 }
 0x3a3   :  { %v668_v55 = vmul.f32 -1.442695, %v218_v54 }
 0x3a5   :  { %720 = vpow2.f32 %v668_v55  ;;  %v121_v55 = vpop.f32.mrf.mxu1 }
 0x3a6   :  { %v213_v56 = vpop.f32.mrf.mxu3 }
 0x3ab   :  { %v721_v57 = vpop.eup %720 }
 0x3ac   :  { %v222_v58 = vadd.f32 1.0, %v721_v57 }
 0x3ae   :  { %722 = vrcp.f32 %v222_v58  ;;  %v234_v62 = vand.u32 2147483648, %v222_v58  ;;  %v232_v0 = vand.u32 2147483647, %v222_v58  ;;  %vm228_vm9 = vweird.f32 %v222_v58 }
 0x3b0   :  { %v235_v2 = vor.u32 1.1754944e-38, %v234_v62  ;;  %vm233_vm11 = vcmp.eq.f32.partialorder %v232_v0, 8.507059e+37 }
 0x3b4   :  { %v723_v59 = vpop.eup %722 }
 0x3b5   :  { %v224_v60 = vmul.f32 %v723_v59, %v222_v58  ;;  %vm229_vm8 = vweird.f32 %v723_v59 }
 0x3b6   :  { %vm230_vm10 = vmor %vm228_vm9, %vm229_vm8 }
 0x3b7   :  { %v225_v61 = vsub.f32 1.0, %v224_v60 }
 0x3b9   :  { %v226_v63 = vmul.f32 %v723_v59, %v225_v61 }
 0x3bb   :  { %v227_v1 = vadd.f32 %v723_v59, %v226_v63 }
 0x3bd   :  { %v231_v3 = vsel %vm230_vm10, %v723_v59, %v227_v1 }
 0x3be   :  { %v236_v4 = vsel %vm233_vm11, %v235_v2, %v231_v3 }
 0x3bf   :  { %v238_v5 = vmul.f32 2.0, %v236_v4  ;;  %v243_v10 = vmul.f32 %v241_v9, %v236_v4 }
 0x3c1   :  { %v669_v6 = vadd.f32 -1.0, %v238_v5 }
 0x3c3   :  { %245 = vrot.lane.b32.xlu2 %v669_v6, %s783_s10 }
 0x41d   :  { %v246_v7 = vpop.permute.xlu2 %245 }
 0x41e   :  { %v248_v8 = vmul.f32 %v246_v7, %v236_v4 }
 0x420   :  { %250 = vrot.lane.b32.xlu2 %v248_v8, %s787_s2 }
 0x47a   :  { %v251_v11 = vpop.permute.xlu2 %250 }
 0x47b   :  { %v253_v12 = vadd.f32 %v251_v11, %v243_v10 }
 0x47d   :  { %724 = vtanh.f32 %v253_v12  ;;  %v307_v42 = vrot.slane %v253_v12, 6 }
 0x483   :  { %v725_v13 = vpop.eup %724 }
 0x484   :  { %256 = vrot.lane.b32.xlu0 %v725_v13, %s783_s10 }
 0x4f6   :  { %v257_v14 = vpop.permute.xlu0 %256 }
 0x4f7   :  { %v259_v15 = vmul.f32 %v257_v14, %v236_v4 }
 0x4f9   :  { %v260_v16 = vpack.c.bf16 %v259_v15, %v259_v15  ;;  %v587_v50 = vsel %vm586_vm0, %v870_v49, %v259_v15 }
 0x4fb   :  { %v262_v17 = vrot.slane %v260_v16, 1 }
 0x4fd   :  { %263 = vrot.lane.b32.xlu1 %v262_v17, %s787_s2 }
 0x56f   :  { %v264_v18 = vpop.permute.xlu1 %263 }
 0x570   :  { %670 = vmatmul.msk.bf16.vlgmr.msrb.gmra.mxu0 %vm106_vm3, %v264_v18 }
 0x5ed   :  { %v277_v19 = vpop.f32.mrf.mxu0 }
 0x5ee   :  { %v282_v20 = vrot.slane %v277_v19, 4 }
 0x5f0   :  { %v284_v21 = vadd.f32 %v282_v20, %v864_v25 }
 0x5f2   :  { %v671_v22 = vmul.f32 -1.442695, %v284_v21 }
 0x5f4   :  { %726 = vpow2.f32 %v671_v22  ;;  %v900_v22 = vadd.f32 %v861_v23, %v121_v55 }
 0x5f5   :  { %v279_v24 = vpop.f32.mrf.mxu0 }
 0x5fa   :  { %v727_v26 = vpop.eup %726 }
 0x5fb   :  { %v288_v27 = vadd.f32 1.0, %v727_v26 }
 0x5fd   :  { %728 = vrcp.f32 %v288_v27  ;;  %v300_v31 = vand.u32 2147483648, %v288_v27  ;;  %v298_v33 = vand.u32 2147483647, %v288_v27  ;;  %vm294_vm13 = vweird.f32 %v288_v27 }
 0x5ff   :  { %v301_v35 = vor.u32 1.1754944e-38, %v300_v31  ;;  %vm299_vm15 = vcmp.eq.f32.partialorder %v298_v33, 8.507059e+37 }
 0x603   :  { %v729_v28 = vpop.eup %728 }
 0x604   :  { %v290_v29 = vmul.f32 %v729_v28, %v288_v27  ;;  %vm295_vm12 = vweird.f32 %v729_v28 }
 0x605   :  { %vm296_vm14 = vmor %vm294_vm13, %vm295_vm12 }
 0x606   :  { %v291_v30 = vsub.f32 1.0, %v290_v29 }
 0x608   :  { %v292_v32 = vmul.f32 %v729_v28, %v291_v30 }
 0x60a   :  { %v293_v34 = vadd.f32 %v729_v28, %v292_v32 }
 0x60c   :  { %v297_v36 = vsel %vm296_vm14, %v729_v28, %v293_v34 }
 0x60d   :  { %v302_v37 = vsel %vm299_vm15, %v301_v35, %v297_v36 }
 0x60e   :  { %v304_v38 = vmul.f32 2.0, %v302_v37  ;;  %v309_v43 = vmul.f32 %v307_v42, %v302_v37 }
 0x610   :  { %v672_v39 = vadd.f32 -1.0, %v304_v38 }
 0x612   :  { %311 = vrot.lane.b32.xlu2 %v672_v39, %s783_s10 }
 0x66c   :  { %v312_v40 = vpop.permute.xlu2 %311 }
 0x66d   :  { %v314_v41 = vmul.f32 %v312_v40, %v302_v37 }
 0x66f   :  { %316 = vrot.lane.b32.xlu0 %v314_v41, %s787_s2 }
 0x6e1   :  { %v317_v44 = vpop.permute.xlu0 %316 }
 0x6e2   :  { %v319_v45 = vadd.f32 %v317_v44, %v309_v43 }
 0x6e4   :  { %730 = vtanh.f32 %v319_v45  ;;  %v373_v11 = vrot.slane %v319_v45, 6 }
 0x6ea   :  { %v731_v46 = vpop.eup %730 }
 0x6eb   :  { %322 = vrot.lane.b32.xlu1 %v731_v46, %s783_s10 }
 0x75d   :  { %v323_v47 = vpop.permute.xlu1 %322 }
 0x75e   :  { %v325_v48 = vmul.f32 %v323_v47, %v302_v37 }
 0x760   :  { %v326_v51 = vpack.c.bf16 %v325_v48, %v325_v48  ;;  %v588_v52 = vsel %vm63_vm1, %v587_v50, %v325_v48 }
 0x762   :  { %v328_v53 = vrot.slane %v326_v51, 2 }
 0x764   :  { %329 = vrot.lane.b32.xlu2 %v328_v53, %s787_s2 }
 0x7be   :  { %v330_v54 = vpop.permute.xlu2 %329 }
 0x7bf   :  { %673 = vmatmul.msk.bf16.vlgmr.msrb.gmra.mxu1 %vm106_vm3, %v330_v54 }
 0x83c   :  { %v343_v56 = vpop.f32.mrf.mxu1 }
 0x83d   :  { %v348_v57 = vrot.slane %v343_v56, 2 }
 0x83f   :  { %v350_v58 = vadd.f32 %v348_v57, %v864_v25 }
 0x841   :  { %v674_v59 = vmul.f32 -1.442695, %v350_v58 }
 0x843   :  { %732 = vpow2.f32 %v674_v59 }
 0x844   :  { %v345_v60 = vpop.f32.mrf.mxu1 }
 0x849   :  { %v733_v61 = vpop.eup %732 }
 0x84a   :  { %v354_v62 = vadd.f32 1.0, %v733_v61 }
 0x84c   :  { %734 = vrcp.f32 %v354_v62  ;;  %v366_v1 = vand.u32 2147483648, %v354_v62  ;;  %v364_v3 = vand.u32 2147483647, %v354_v62  ;;  %vm360_vm4 = vweird.f32 %v354_v62 }
 0x84e   :  { %v367_v5 = vor.u32 1.1754944e-38, %v366_v1  ;;  %vm365_vm6 = vcmp.eq.f32.partialorder %v364_v3, 8.507059e+37 }
 0x852   :  { %v735_v49 = vpop.eup %734 }
 0x853   :  { %v356_v63 = vmul.f32 %v735_v49, %v354_v62  ;;  %vm361_vm2 = vweird.f32 %v735_v49 }
 0x854   :  { %vm362_vm5 = vmor %vm360_vm4, %vm361_vm2 }
 0x855   :  { %v357_v0 = vsub.f32 1.0, %v356_v63 }
 0x857   :  { %v358_v2 = vmul.f32 %v735_v49, %v357_v0 }
 0x859   :  { %v359_v4 = vadd.f32 %v735_v49, %v358_v2 }
 0x85b   :  { %v363_v6 = vsel %vm362_vm5, %v735_v49, %v359_v4 }
 0x85c   :  { %v368_v25 = vsel %vm365_vm6, %v367_v5, %v363_v6 }
 0x85d   :  { %v370_v7 = vmul.f32 2.0, %v368_v25  ;;  %v375_v12 = vmul.f32 %v373_v11, %v368_v25 }
 0x85f   :  { %v675_v8 = vadd.f32 -1.0, %v370_v7 }
 0x861   :  { %377 = vrot.lane.b32.xlu0 %v675_v8, %s783_s10 }
 0x8d3   :  { %v378_v9 = vpop.permute.xlu0 %377 }
 0x8d4   :  { %v380_v10 = vmul.f32 %v378_v9, %v368_v25 }
 0x8d6   :  { %382 = vrot.lane.b32.xlu1 %v380_v10, %s787_s2 }
 0x948   :  { %v383_v13 = vpop.permute.xlu1 %382 }
 0x949   :  { %v385_v14 = vadd.f32 %v383_v13, %v375_v12 }
 0x94b   :  { %736 = vtanh.f32 %v385_v14  ;;  %v436_v44 = vrot.slane %v385_v14, 6 }
 0x951   :  { %v737_v15 = vpop.eup %736 }
 0x952   :  { %388 = vrot.lane.b32.xlu2 %v737_v15, %s783_s10 }
 0x9ac   :  { %v389_v16 = vpop.permute.xlu2 %388 }
 0x9ad   :  { %v391_v17 = vmul.f32 %v389_v16, %v368_v25 }
 0x9af   :  { %v392_v18 = vpack.c.bf16 %v391_v17, %v391_v17  ;;  %v895_v19 = vsel %vm589_vm7, %v588_v52, %v391_v17  ;;  %vm634_vm7 = vcmask 48128  }
 0x9b1   :  { %v394_v20 = vrot.slane %v392_v18, 3 }
 0x9b3   :  { %395 = vrot.lane.b32.xlu0 %v394_v20, %s787_s2 }
 0xa25   :  { %v396_v21 = vpop.permute.xlu0 %395 }
 0xa26   :  { %676 = vmatmul.msk.bf16.vlgmr.msrb.gmra.mxu2 %vm106_vm3, %v396_v21 }
 0xaa9   :  { %v409_v24 = vpop.f32.mrf.mxu2 }
 0xaaa   :  { %v413_v26 = vadd.f32 %v409_v24, %v900_v22 }
 0xaac   :  { %v677_v27 = vmul.f32 -1.442695, %v413_v26 }
 0xaae   :  { %738 = vpow2.f32 %v677_v27 }
 0xab1   :  { %v411_v28 = vpop.f32.mrf.mxu2 }
 0xab4   :  { %v739_v29 = vpop.eup %738 }
 0xab5   :  { %v417_v30 = vadd.f32 1.0, %v739_v29 }
 0xab7   :  { %740 = vrcp.f32 %v417_v30  ;;  %v429_v34 = vand.u32 2147483648, %v417_v30  ;;  %v427_v36 = vand.u32 2147483647, %v417_v30  ;;  %vm423_vm9 = vweird.f32 %v417_v30 }
 0xab9   :  { %v430_v23 = vor.u32 1.1754944e-38, %v429_v34  ;;  %vm428_vm11 = vcmp.eq.f32.partialorder %v427_v36, 8.507059e+37 }
 0xabd   :  { %v741_v31 = vpop.eup %740 }
 0xabe   :  { %v419_v32 = vmul.f32 %v741_v31, %v417_v30  ;;  %vm424_vm8 = vweird.f32 %v741_v31 }
 0xabf   :  { %vm425_vm10 = vmor %vm423_vm9, %vm424_vm8 }
 0xac0   :  { %v420_v33 = vsub.f32 1.0, %v419_v32 }
 0xac2   :  { %v421_v35 = vmul.f32 %v741_v31, %v420_v33 }
 0xac4   :  { %v422_v37 = vadd.f32 %v741_v31, %v421_v35 }
 0xac6   :  { %v426_v38 = vsel %vm425_vm10, %v741_v31, %v422_v37 }
 0xac7   :  { %v431_v39 = vsel %vm428_vm11, %v430_v23, %v426_v38 }
 0xac8   :  { %v433_v40 = vmul.f32 2.0, %v431_v39  ;;  %v438_v45 = vmul.f32 %v436_v44, %v431_v39 }
 0xaca   :  { %v678_v41 = vadd.f32 -1.0, %v433_v40 }
 0xacc   :  { %440 = vrot.lane.b32.xlu1 %v678_v41, %s783_s10 }
 0xb3e   :  { %v441_v42 = vpop.permute.xlu1 %440 }
 0xb3f   :  { %v443_v43 = vmul.f32 %v441_v42, %v431_v39 }
 0xb41   :  { %445 = vrot.lane.b32.xlu2 %v443_v43, %s787_s2 }
 0xb9b   :  { %v446_v46 = vpop.permute.xlu2 %445 }
 0xb9c   :  { %v448_v47 = vadd.f32 %v446_v46, %v438_v45 }
 0xb9e   :  { %742 = vtanh.f32 %v448_v47  ;;  %v501_v9 = vrot.slane %v448_v47, 6  ;;  %v700_v47 = vld [vmem:[%s949_s6 + $0x8] sm:$0xff] }
 0xb9f   :  { %626 = vmatpush.bf16.msra.mxu1 %v700_v47 }
 0xba4   :  { %v743_v48 = vpop.eup %742 }
 0xba5   :  { %451 = vrot.lane.b32.xlu0 %v743_v48, %s783_s10  ;;  %v699_v48 = vld [vmem:[%s949_s6] sm:$0xff] }
 0xba6   :  { %627 = vmatpush.bf16.msra.mxu1 %v699_v48 }
 0xc17   :  { %v452_v50 = vpop.permute.xlu0 %451 }
 0xc18   :  { %v906_v51 = vmul.f32 %v452_v50, %v431_v39 }
 0xc1a   :  { %v455_v52 = vpack.c.bf16 %v906_v51, %v906_v51 }
 0xc1c   :  { %457 = vrot.lane.b32.xlu1 %v455_v52, %s787_s2 }
 0xc8e   :  { %v458_v53 = vpop.permute.xlu1 %457 }
 0xc8f   :  { %679 = vmatmul.msk.bf16.vlgmr.msrb.gmra.mxu3 %vm106_vm3, %v458_v53 }
 0xd12   :  { %v471_v54 = vpop.f32.mrf.mxu3 }
 0xd13   :  { %v476_v55 = vrot.slane %v471_v54, 6 }
 0xd15   :  { %v478_v56 = vadd.f32 %v476_v55, %v900_v22 }
 0xd17   :  { %v680_v57 = vmul.f32 -1.442695, %v478_v56 }
 0xd19   :  { %744 = vpow2.f32 %v680_v57  ;;  %v709_v57 = vld [vmem:[%s950_s7] ss:$0 sm:$0xff] }
 0xd1a   :  { %v473_v58 = vpop.f32.mrf.mxu3 }
 0xd1f   :  { %v745_v59 = vpop.eup %744 }
 0xd20   :  { %v482_v60 = vadd.f32 1.0, %v745_v59 }
 0xd22   :  { %746 = vrcp.f32 %v482_v60  ;;  %v494_v63 = vand.u32 2147483648, %v482_v60  ;;  %v492_v1 = vand.u32 2147483647, %v482_v60  ;;  %vm488_vm13 = vweird.f32 %v482_v60 }
 0xd24   :  { %v495_v3 = vor.u32 1.1754944e-38, %v494_v63  ;;  %vm493_vm15 = vcmp.eq.f32.partialorder %v492_v1, 8.507059e+37 }
 0xd28   :  { %v747_v61 = vpop.eup %746 }
 0xd29   :  { %v484_v62 = vmul.f32 %v747_v61, %v482_v60  ;;  %vm489_vm12 = vweird.f32 %v747_v61 }
 0xd2a   :  { %vm490_vm14 = vmor %vm488_vm13, %vm489_vm12 }
 0xd2b   :  { %v485_v49 = vsub.f32 1.0, %v484_v62 }
 0xd2d   :  { %v486_v0 = vmul.f32 %v747_v61, %v485_v49 }
 0xd2f   :  { %v487_v2 = vadd.f32 %v747_v61, %v486_v0 }
 0xd31   :  { %v491_v4 = vsel %vm490_vm14, %v747_v61, %v487_v2 }
 0xd32   :  { %v496_v5 = vsel %vm493_vm15, %v495_v3, %v491_v4 }
 0xd33   :  { %v498_v6 = vmul.f32 2.0, %v496_v5  ;;  %v503_v10 = vmul.f32 %v501_v9, %v496_v5 }
 0xd35   :  { %v681_v25 = vadd.f32 -1.0, %v498_v6 }
 0xd37   :  { %505 = vrot.lane.b32.xlu2 %v681_v25, %s783_s10 }
 0xd91   :  { %v506_v7 = vpop.permute.xlu2 %505 }
 0xd92   :  { %v508_v8 = vmul.f32 %v506_v7, %v496_v5 }
 0xd94   :  { %510 = vrot.lane.b32.xlu0 %v508_v8, %s787_s2 }
 0xe06   :  { %v511_v11 = vpop.permute.xlu0 %510 }
 0xe07   :  { %v513_v12 = vadd.f32 %v511_v11, %v503_v10 }
 0xe09   :  { %748 = vtanh.f32 %v513_v12  ;;  %v567_v42 = vrot.slane %v513_v12, 6 }
 0xe0f   :  { %v749_v13 = vpop.eup %748 }
 0xe10   :  { %516 = vrot.lane.b32.xlu1 %v749_v13, %s783_s10 }
 0xe82   :  { %v517_v14 = vpop.permute.xlu1 %516 }
 0xe83   :  { %v519_v15 = vmul.f32 %v517_v14, %v496_v5 }
 0xe85   :  { %v520_v16 = vpack.c.bf16 %v519_v15, %v519_v15  ;;  %v591_v53 = vsel %vm586_vm0, %v906_v51, %v519_v15 }
 0xe87   :  { %v522_v17 = vrot.slane %v520_v16, 1 }
 0xe89   :  { %523 = vrot.lane.b32.xlu2 %v522_v17, %s787_s2 }
 0xee3   :  { %v524_v18 = vpop.permute.xlu2 %523 }
 0xee4   :  { %682 = vmatmul.msk.bf16.vlgmr.msra.gmra.mxu0 %vm106_vm3, %v524_v18 }
 0xf61   :  { %v537_v20 = vpop.f32.mrf.mxu0 }
 0xf62   :  { %v542_v21 = vrot.slane %v537_v20, 4 }
 0xf64   :  { %v544_v24 = vadd.f32 %v542_v21, %v900_v22 }
 0xf66   :  { %v683_v26 = vmul.f32 -1.442695, %v544_v24 }
 0xf68   :  { %750 = vpow2.f32 %v683_v26 }
 0xf69   :  { %v539_v27 = vpop.f32.mrf.mxu0 }
 0xf6e   :  { %v751_v28 = vpop.eup %750 }
 0xf6f   :  { %v548_v29 = vadd.f32 1.0, %v751_v28 }
 0xf71   :  { %752 = vrcp.f32 %v548_v29  ;;  %v560_v33 = vand.u32 2147483648, %v548_v29  ;;  %v558_v35 = vand.u32 2147483647, %v548_v29  ;;  %vm554_vm4 = vweird.f32 %v548_v29 }
 0xf73   :  { %v561_v37 = vor.u32 1.1754944e-38, %v560_v33  ;;  %vm559_vm6 = vcmp.eq.f32.partialorder %v558_v35, 8.507059e+37 }
 0xf77   :  { %v753_v30 = vpop.eup %752 }
 0xf78   :  { %v550_v31 = vmul.f32 %v753_v30, %v548_v29  ;;  %vm555_vm2 = vweird.f32 %v753_v30 }
 0xf79   :  { %vm556_vm5 = vmor %vm554_vm4, %vm555_vm2 }
 0xf7a   :  { %v551_v32 = vsub.f32 1.0, %v550_v31 }
 0xf7c   :  { %v552_v34 = vmul.f32 %v753_v30, %v551_v32 }
 0xf7e   :  { %v553_v36 = vadd.f32 %v753_v30, %v552_v34 }
 0xf80   :  { %v557_v23 = vsel %vm556_vm5, %v753_v30, %v553_v36 }
 0xf81   :  { %v562_v22 = vsel %vm559_vm6, %v561_v37, %v557_v23 }
 0xf82   :  { %v564_v38 = vmul.f32 2.0, %v562_v22  ;;  %v569_v43 = vmul.f32 %v567_v42, %v562_v22 }
 0xf84   :  { %v684_v39 = vadd.f32 -1.0, %v564_v38 }
 0xf86   :  { %571 = vrot.lane.b32.xlu0 %v684_v39, %s783_s10 }
 0xff8   :  { %v572_v40 = vpop.permute.xlu0 %571 }
 0xff9   :  { %v574_v41 = vmul.f32 %v572_v40, %v562_v22 }
 0xffb   :  { %576 = vrot.lane.b32.xlu1 %v574_v41, %s787_s2 }
0x106d   :  { %v577_v44 = vpop.permute.xlu1 %576 }
0x106e   :  { %v579_v45 = vadd.f32 %v577_v44, %v569_v43 }
0x1070   :  { %754 = vtanh.f32 %v579_v45 }
0x1076   :  { %v755_v46 = vpop.eup %754 }
0x1077   :  { %582 = vrot.lane.b32.xlu2 %v755_v46, %s783_s10 }
0x10d1   :  { %v583_v50 = vpop.permute.xlu2 %582 }
0x10d2   :  { %v585_v52 = vmul.f32 %v583_v50, %v562_v22 }
0x10d4   :  { %v592_v54 = vsel %vm63_vm1, %v591_v53, %v585_v52  ;;  %vm636_vm1 = vcmask 46080  }
0x10d5   :  { %v593_v55 = vpack.c.bf16 %v592_v54, %v895_v19 }
0x10d7   :  { %603 = vrot.lane.b32.xlu0 %v593_v55, %s787_s2 }
0x1149   :  { %v604_v56 = vpop.permute.xlu0 %603 }
0x114a   :  { %693 = vmatmul.msk.bf16.vlgmr.msra.gmra.mxu1 %vm106_vm3, %v604_v56 }
0x11c7   :  { %v629_v58 = vpop.f32.mrf.mxu1 }
0x11c8   :  { %v630_v59 = vadd.f32 %v709_v57, %v629_v58 }
0x11ca   :  { %635 = vst.msk [vmem:[%s951_s8] sm:$0xff] %vm634_vm7, %v630_v59 }
0x11cf   :  { %v631_v51 = vpop.f32.mrf.mxu1 }
0x11d0   :  { %v632_v60 = vadd.f32 %v709_v57, %v631_v51 }
0x11d2   :  { %637 = vst.msk [vmem:[%s951_s8 + $0x8] sm:$0x3f] %vm636_vm1, %v632_v60 }
0x11d3   :  { %642 = vsyncpa [#allocation3], 1 }

</bundles_post_ra>
